<compile_context>
chip_gen: v7x
topology: tpu7x:2x2x1
jax: 0.10.0
libtpu: 0.0.40
codegen_flags: <defaults>
</compile_context>

<pallas_src>
import functools

import jax
import jax.numpy as jnp
from jax import lax
from jax.experimental import pallas as pl
from jax.experimental.pallas import tpu as pltpu


CHUNK = 8  # samples per grid step (>= 8 sublanes -> MXU matmuls are not M=1)


def memstream_kernel(x_ref, mean_ref, std_ref,
                     wenc_ref, benc_ref, wdec_ref, bdec_ref,
                     memt_ref,
                     out_ref,
                     *, gamma, K, in_dim):
    x = x_ref[...]                       # (CHUNK, in_dim)
    mu = mean_ref[...]                   # (1, in_dim)
    sd = std_ref[...]                    # (1, in_dim)

    # new = (x - mean) / std ; new[:, std == 0] = 0
    new = jnp.where(sd == 0.0, 0.0, (x - mu) / sd)            # (CHUNK, in_dim)

    # encoder: Linear(in_dim -> out_dim) + Tanh.   M == CHUNK >= 8 sublanes.
    enc = jnp.tanh(
        jnp.dot(new, wenc_ref[...], preferred_element_type=jnp.float32)
        + benc_ref[...])                                      # (CHUNK, out_dim)

    # decoder: Linear(out_dim -> in_dim)
    rec = (jnp.dot(enc, wdec_ref[...], preferred_element_type=jnp.float32)
           + bdec_ref[...])                                   # (CHUNK, in_dim)

    # per-sample MSE reconstruction loss (== nn.MSELoss with batch 1)
    loss = jnp.sum((rec - new) ** 2, axis=1, keepdims=True) * (1.0 / in_dim)

    # L1 distances to all memory rows, lane-dense.
    # memt_ref is (out_dim, mem_len); accumulate over the out_dim features so
    # the distance matrix lives in a single (CHUNK, mem_len) vreg.
    mem_t = memt_ref[...]                                     # (out_dim, mem_len)
    out_dim, mem_len = mem_t.shape
    dist = jnp.zeros((x.shape[0], mem_len), jnp.float32)
    for j in range(out_dim):                                  # 8x, unrolled
        dist = dist + jnp.abs(mem_t[j:j + 1, :] - enc[:, j:j + 1])

    # top-K smallest distances (iterative min + mask), weighted by gamma**i,
    # all CHUNK samples at once: each step is one lane-reduce on one vreg.
    ids = lax.broadcasted_iota(jnp.int32, dist.shape, 1)
    cur = dist
    acc = jnp.zeros_like(loss)
    wsum = 0.0
    for i in range(K):
        mval = jnp.min(cur, axis=1, keepdims=True)            # (CHUNK, 1)
        midx = jnp.min(jnp.where(cur == mval, ids, mem_len),
                       axis=1, keepdims=True)                 # (CHUNK, 1)
        w = float(gamma ** i)
        acc = acc + mval * w
        wsum += w
        cur = jnp.where(ids == midx, jnp.float32(jnp.inf), cur)
    knn = acc * (1.0 / wsum)                                  # (CHUNK, 1)

    # single packed output block: [:, 0] = model_loss, [:, 1] = knn
    out_ref[:, 0:1] = loss
    out_ref[:, 1:2] = knn


def memstream_forward(x, mean, std, w_enc, b_enc, w_dec, b_dec, memory,
                      *, gamma=0.5, K=3, skip_threshold=1.0,
                      win_mean=0.0, win_std=1.0):
    B, in_dim = x.shape
    mem_len, out_dim = memory.shape

    # memory transposed once outside the kernel: (out_dim, mem_len) keeps the
    # whole distance path lane-dense inside the kernel.
    mem_t = jnp.asarray(memory, jnp.float32).T

    # pad the batch up to a multiple of CHUNK (padded rows are sliced off)
    b_pad = (-B) % CHUNK
    if b_pad:
        x = jnp.pad(x, ((0, b_pad), (0, 0)))
    n_chunks = (B + b_pad) // CHUNK

    kernel = functools.partial(memstream_kernel, gamma=gamma, K=K,
                               in_dim=in_dim)

    def resident(shape):  # same block every grid step -> stays in VMEM
        return pl.BlockSpec(shape, lambda i: (0, 0))

    out = pl.pallas_call(
        kernel,
        out_shape=jax.ShapeDtypeStruct((B + b_pad, 2), jnp.float32),
        grid_spec=pltpu.PrefetchScalarGridSpec(
            num_scalar_prefetch=0,
            grid=(n_chunks,),
            in_specs=[
                pl.BlockSpec((CHUNK, in_dim), lambda i: (i, 0)),  # x (per chunk)
                resident((1, in_dim)),            # mean
                resident((1, in_dim)),            # std
                resident((in_dim, out_dim)),      # W_enc
                resident((1, out_dim)),           # b_enc
                resident((out_dim, in_dim)),      # W_dec
                resident((1, in_dim)),            # b_dec
                resident((out_dim, mem_len)),     # memory^T
            ],
            out_specs=pl.BlockSpec((CHUNK, 2), lambda i: (i, 0)),
        ),
        compiler_params=pltpu.CompilerParams(
            dimension_semantics=("parallel",)),   # v7x: two TCs split the batch
    )(x, mean, std, w_enc, b_enc, w_dec, b_dec, mem_t)

    out = out[:B]
    model_loss = out[:, 0]
    loss_values = out[:, 1]

    # window_loss scalar post-processing, once for the whole batch.
    # (WindowLoss initial state: population_std == 0 -> mean=win_mean, std=1.)
    loss_scaled = (model_loss - win_mean) / win_std
    prob = jax.scipy.special.ndtr(loss_scaled)
    win_loss = (skip_threshold - prob) / skip_threshold * model_loss

    # TODO(synk): stateful side-effects (self.memory / self.mem_data FIFO
    # replacement and WindowLoss.update) are host-side state and are not
    # reproduced; they do not affect the value returned by this forward call.
    loss_combined = win_loss + loss_values
    return loss_combined, model_loss


def reference_forward(x, mean, std, w_enc, b_enc, w_dec, b_dec, memory,
                      *, gamma=0.5, K=3, skip_threshold=1.0,
                      win_mean=0.0, win_std=1.0):
    new = jnp.where(std == 0.0, 0.0, (x - mean) / std)          # (B, in_dim)
    enc = jnp.tanh(new @ w_enc + b_enc)                         # (B, out_dim)
    rec = enc @ w_dec + b_dec                                   # (B, in_dim)
    loss = jnp.mean((rec - new) ** 2, axis=1)                   # (B,)
    d = jnp.sum(jnp.abs(memory[None, :, :] - enc[:, None, :]), axis=2)
    neg_top, _ = lax.top_k(-d, K)                               # (B, K)
    dist = -neg_top
    expw = gamma ** jnp.arange(K, dtype=jnp.float32)
    knn = jnp.sum(dist * expw, axis=1) / jnp.sum(expw)          # (B,)
    loss_scaled = (loss - win_mean) / win_std
    prob = jax.scipy.special.ndtr(loss_scaled)
    win_loss = (skip_threshold - prob) / skip_threshold * loss
    return win_loss + knn, loss


if __name__ == "__main__":
    # small shapes consistent with MemStream: dim=5 -> out_dim = in_dim // 5
    in_dim = 40
    dim = 5
    out_dim = in_dim // dim          # 8
    memory_len = 128
    batch = 32                       # streaming samples processed per call
    gamma = 0.5
    K = 3
    skip_threshold = 1.0

    key = jax.random.PRNGKey(0)
    k_x, k_mem, k_md, k_we, k_be, k_wd, k_bd = jax.random.split(key, 7)

    x = jax.random.normal(k_x, (batch, in_dim), jnp.float32)
    memory = jax.random.normal(k_mem, (memory_len, out_dim), jnp.float32)
    mem_data = jax.random.normal(k_md, (memory_len, in_dim), jnp.float32)

    # deterministic "trained" parameters
    w_enc = 0.1 * jax.random.normal(k_we, (in_dim, out_dim), jnp.float32)
    b_enc = 0.1 * jax.random.normal(k_be, (1, out_dim), jnp.float32)
    w_dec = 0.1 * jax.random.normal(k_wd, (out_dim, in_dim), jnp.float32)
    b_dec = 0.1 * jax.random.normal(k_bd, (1, in_dim), jnp.float32)

    # self.mean / self.std come from mem_data (torch.std is unbiased, ddof=1)
    mean = jnp.mean(mem_data, axis=0, keepdims=True)
    std = jnp.std(mem_data, axis=0, ddof=1, keepdims=True)

    loss_combined, model_loss = memstream_forward(
        x, mean, std, w_enc, b_enc, w_dec, b_dec, memory,
        gamma=gamma, K=K, skip_threshold=skip_threshold)
    loss_combined = jax.block_until_ready(loss_combined)

    ref_combined, ref_loss = reference_forward(
        x, mean, std, w_enc, b_enc, w_dec, b_dec, memory,
        gamma=gamma, K=K, skip_threshold=skip_threshold)

    assert jnp.allclose(loss_combined, ref_combined, rtol=1e-5, atol=1e-5), \
        (loss_combined, ref_combined)
    assert jnp.allclose(model_loss, ref_loss, rtol=1e-5, atol=1e-5), \
        (model_loss, ref_loss)

    print("KERNEL_OK")
</pallas_src>

<mosaic_0001>
module attributes {stable_mosaic.version = 11 : i64} {
  func.func @memstream_kernel(%arg0: i32, %arg1: memref<8x40xf32, #tpu.memory_space<vmem>>, %arg2: memref<1x40xf32, #tpu.memory_space<vmem>>, %arg3: memref<1x40xf32, #tpu.memory_space<vmem>>, %arg4: memref<40x8xf32, #tpu.memory_space<vmem>>, %arg5: memref<1x8xf32, #tpu.memory_space<vmem>>, %arg6: memref<8x40xf32, #tpu.memory_space<vmem>>, %arg7: memref<1x40xf32, #tpu.memory_space<vmem>>, %arg8: memref<8x128xf32, #tpu.memory_space<vmem>>, %arg9: memref<8x2xf32, #tpu.memory_space<vmem>>) attributes {dimension_semantics = [#tpu.dimension_semantics<parallel>], iteration_bounds = array<i64: 4>, scalar_prefetch = 0 : i64, scratch_operands = 0 : i64, tpu.core_type = #tpu.core_type<tc>, window_params = [{transform_indices = @transform_0, window_bounds = array<i64: 8, 40>}, {pipeline_mode = #tpu.pipeline_mode<synchronous>, transform_indices = @transform_1, window_bounds = array<i64: 1, 40>}, {pipeline_mode = #tpu.pipeline_mode<synchronous>, transform_indices = @transform_2, window_bounds = array<i64: 1, 40>}, {pipeline_mode = #tpu.pipeline_mode<synchronous>, transform_indices = @transform_3, window_bounds = array<i64: 40, 8>}, {pipeline_mode = #tpu.pipeline_mode<synchronous>, transform_indices = @transform_4, window_bounds = array<i64: 1, 8>}, {pipeline_mode = #tpu.pipeline_mode<synchronous>, transform_indices = @transform_5, window_bounds = array<i64: 8, 40>}, {pipeline_mode = #tpu.pipeline_mode<synchronous>, transform_indices = @transform_6, window_bounds = array<i64: 1, 40>}, {pipeline_mode = #tpu.pipeline_mode<synchronous>, transform_indices = @transform_7, window_bounds = array<i64: 8, 128>}, {transform_indices = @transform_8, window_bounds = array<i64: 8, 2>}]} {
    %c0 = arith.constant 0 : index
    %c0_0 = arith.constant 0 : index
    %0 = vector.load %arg1[%c0, %c0_0] : memref<8x40xf32, #tpu.memory_space<vmem>>, vector<8x40xf32>
    %c0_1 = arith.constant 0 : index
    %c0_2 = arith.constant 0 : index
    %1 = vector.load %arg2[%c0_1, %c0_2] : memref<1x40xf32, #tpu.memory_space<vmem>>, vector<1x40xf32>
    %c0_3 = arith.constant 0 : index
    %c0_4 = arith.constant 0 : index
    %2 = vector.load %arg3[%c0_3, %c0_4] : memref<1x40xf32, #tpu.memory_space<vmem>>, vector<1x40xf32>
    %cst = arith.constant 0.000000e+00 : f32
    %3 = vector.broadcast %cst : f32 to vector<1x40xf32>
    %4 = arith.cmpf oeq, %2, %3 : vector<1x40xf32>
    %5 = vector.broadcast %1 : vector<1x40xf32> to vector<8x40xf32>
    %6 = arith.subf %0, %5 : vector<8x40xf32>
    %7 = vector.broadcast %2 : vector<1x40xf32> to vector<8x40xf32>
    %8 = arith.divf %6, %7 : vector<8x40xf32>
    %cst_5 = arith.constant 0.000000e+00 : f32
    %9 = vector.shape_cast %4 : vector<1x40xi1> to vector<1x40xi1>
    %10 = vector.broadcast %9 : vector<1x40xi1> to vector<8x40xi1>
    %11 = vector.broadcast %cst_5 : f32 to vector<8x40xf32>
    %12 = arith.select %10, %11, %8 : vector<8x40xi1>, vector<8x40xf32>
    %c0_6 = arith.constant 0 : index
    %c0_7 = arith.constant 0 : index
    %13 = vector.load %arg4[%c0_6, %c0_7] : memref<40x8xf32, #tpu.memory_space<vmem>>, vector<40x8xf32>
    %cst_8 = arith.constant dense<0.000000e+00> : vector<8x8xf32>
    %14 = tpu.matmul %12, %13, %cst_8 {dimension_numbers = #tpu.dot_dimension_numbers<[1], [0], [0], [1], [0, 0, 1, 1], [], []>} : vector<8x40xf32>, vector<40x8xf32>, vector<8x8xf32> -> vector<8x8xf32>
    %c0_9 = arith.constant 0 : index
    %c0_10 = arith.constant 0 : index
    %15 = vector.load %arg5[%c0_9, %c0_10] : memref<1x8xf32, #tpu.memory_space<vmem>>, vector<1x8xf32>
    %16 = vector.broadcast %15 : vector<1x8xf32> to vector<8x8xf32>
    %17 = arith.addf %14, %16 : vector<8x8xf32>
    %18 = math.tanh %17 : vector<8x8xf32>
    %c0_11 = arith.constant 0 : index
    %c0_12 = arith.constant 0 : index
    %19 = vector.load %arg6[%c0_11, %c0_12] : memref<8x40xf32, #tpu.memory_space<vmem>>, vector<8x40xf32>
    %cst_13 = arith.constant dense<0.000000e+00> : vector<8x40xf32>
    %20 = tpu.matmul %18, %19, %cst_13 {dimension_numbers = #tpu.dot_dimension_numbers<[1], [0], [0], [1], [0, 0, 1, 1], [], []>} : vector<8x8xf32>, vector<8x40xf32>, vector<8x40xf32> -> vector<8x40xf32>
    %c0_14 = arith.constant 0 : index
    %c0_15 = arith.constant 0 : index
    %21 = vector.load %arg7[%c0_14, %c0_15] : memref<1x40xf32, #tpu.memory_space<vmem>>, vector<1x40xf32>
    %22 = vector.broadcast %21 : vector<1x40xf32> to vector<8x40xf32>
    %23 = arith.addf %20, %22 : vector<8x40xf32>
    %24 = arith.subf %23, %12 : vector<8x40xf32>
    %25 = arith.mulf %24, %24 : vector<8x40xf32>
    %cst_16 = arith.constant dense<0.000000e+00> : vector<8xf32>
    %26 = vector.multi_reduction <add>, %25, %cst_16 [1] : vector<8x40xf32> to vector<8xf32>
    %27 = vector.shape_cast %26 : vector<8xf32> to vector<8x1xf32>
    %cst_17 = arith.constant 2.500000e-02 : f32
    %28 = vector.broadcast %cst_17 : f32 to vector<8x1xf32>
    %29 = arith.mulf %27, %28 : vector<8x1xf32>
    %c0_18 = arith.constant 0 : index
    %c0_19 = arith.constant 0 : index
    %30 = vector.load %arg8[%c0_18, %c0_19] : memref<8x128xf32, #tpu.memory_space<vmem>>, vector<8x128xf32>
    %cst_20 = arith.constant 0.000000e+00 : f32
    %31 = vector.broadcast %cst_20 : f32 to vector<8x128xf32>
    %32 = vector.extract_strided_slice %30 {offsets = [0, 0], sizes = [1, 128], strides = [1, 1]} : vector<8x128xf32> to vector<1x128xf32>
    %33 = vector.extract_strided_slice %18 {offsets = [0, 0], sizes = [8, 1], strides = [1, 1]} : vector<8x8xf32> to vector<8x1xf32>
    %34 = vector.broadcast %32 : vector<1x128xf32> to vector<8x128xf32>
    %35 = vector.broadcast %33 : vector<8x1xf32> to vector<8x128xf32>
    %36 = arith.subf %34, %35 : vector<8x128xf32>
    %37 = math.absf %36 : vector<8x128xf32>
    %38 = arith.addf %31, %37 : vector<8x128xf32>
    %39 = vector.extract_strided_slice %30 {offsets = [1, 0], sizes = [1, 128], strides = [1, 1]} : vector<8x128xf32> to vector<1x128xf32>
    %40 = vector.extract_strided_slice %18 {offsets = [0, 1], sizes = [8, 1], strides = [1, 1]} : vector<8x8xf32> to vector<8x1xf32>
    %41 = vector.broadcast %39 : vector<1x128xf32> to vector<8x128xf32>
    %42 = vector.broadcast %40 : vector<8x1xf32> to vector<8x128xf32>
    %43 = arith.subf %41, %42 : vector<8x128xf32>
    %44 = math.absf %43 : vector<8x128xf32>
    %45 = arith.addf %38, %44 : vector<8x128xf32>
    %46 = vector.extract_strided_slice %30 {offsets = [2, 0], sizes = [1, 128], strides = [1, 1]} : vector<8x128xf32> to vector<1x128xf32>
    %47 = vector.extract_strided_slice %18 {offsets = [0, 2], sizes = [8, 1], strides = [1, 1]} : vector<8x8xf32> to vector<8x1xf32>
    %48 = vector.broadcast %46 : vector<1x128xf32> to vector<8x128xf32>
    %49 = vector.broadcast %47 : vector<8x1xf32> to vector<8x128xf32>
    %50 = arith.subf %48, %49 : vector<8x128xf32>
    %51 = math.absf %50 : vector<8x128xf32>
    %52 = arith.addf %45, %51 : vector<8x128xf32>
    %53 = vector.extract_strided_slice %30 {offsets = [3, 0], sizes = [1, 128], strides = [1, 1]} : vector<8x128xf32> to vector<1x128xf32>
    %54 = vector.extract_strided_slice %18 {offsets = [0, 3], sizes = [8, 1], strides = [1, 1]} : vector<8x8xf32> to vector<8x1xf32>
    %55 = vector.broadcast %53 : vector<1x128xf32> to vector<8x128xf32>
    %56 = vector.broadcast %54 : vector<8x1xf32> to vector<8x128xf32>
    %57 = arith.subf %55, %56 : vector<8x128xf32>
    %58 = math.absf %57 : vector<8x128xf32>
    %59 = arith.addf %52, %58 : vector<8x128xf32>
    %60 = vector.extract_strided_slice %30 {offsets = [4, 0], sizes = [1, 128], strides = [1, 1]} : vector<8x128xf32> to vector<1x128xf32>
    %61 = vector.extract_strided_slice %18 {offsets = [0, 4], sizes = [8, 1], strides = [1, 1]} : vector<8x8xf32> to vector<8x1xf32>
    %62 = vector.broadcast %60 : vector<1x128xf32> to vector<8x128xf32>
    %63 = vector.broadcast %61 : vector<8x1xf32> to vector<8x128xf32>
    %64 = arith.subf %62, %63 : vector<8x128xf32>
    %65 = math.absf %64 : vector<8x128xf32>
    %66 = arith.addf %59, %65 : vector<8x128xf32>
    %67 = vector.extract_strided_slice %30 {offsets = [5, 0], sizes = [1, 128], strides = [1, 1]} : vector<8x128xf32> to vector<1x128xf32>
    %68 = vector.extract_strided_slice %18 {offsets = [0, 5], sizes = [8, 1], strides = [1, 1]} : vector<8x8xf32> to vector<8x1xf32>
    %69 = vector.broadcast %67 : vector<1x128xf32> to vector<8x128xf32>
    %70 = vector.broadcast %68 : vector<8x1xf32> to vector<8x128xf32>
    %71 = arith.subf %69, %70 : vector<8x128xf32>
    %72 = math.absf %71 : vector<8x128xf32>
    %73 = arith.addf %66, %72 : vector<8x128xf32>
    %74 = vector.extract_strided_slice %30 {offsets = [6, 0], sizes = [1, 128], strides = [1, 1]} : vector<8x128xf32> to vector<1x128xf32>
    %75 = vector.extract_strided_slice %18 {offsets = [0, 6], sizes = [8, 1], strides = [1, 1]} : vector<8x8xf32> to vector<8x1xf32>
    %76 = vector.broadcast %74 : vector<1x128xf32> to vector<8x128xf32>
    %77 = vector.broadcast %75 : vector<8x1xf32> to vector<8x128xf32>
    %78 = arith.subf %76, %77 : vector<8x128xf32>
    %79 = math.absf %78 : vector<8x128xf32>
    %80 = arith.addf %73, %79 : vector<8x128xf32>
    %81 = vector.extract_strided_slice %30 {offsets = [7, 0], sizes = [1, 128], strides = [1, 1]} : vector<8x128xf32> to vector<1x128xf32>
    %82 = vector.extract_strided_slice %18 {offsets = [0, 7], sizes = [8, 1], strides = [1, 1]} : vector<8x8xf32> to vector<8x1xf32>
    %83 = vector.broadcast %81 : vector<1x128xf32> to vector<8x128xf32>
    %84 = vector.broadcast %82 : vector<8x1xf32> to vector<8x128xf32>
    %85 = arith.subf %83, %84 : vector<8x128xf32>
    %86 = math.absf %85 : vector<8x128xf32>
    %87 = arith.addf %80, %86 : vector<8x128xf32>
    %88 = tpu.iota {dimensions = array<i32: 1>} : vector<8x128xi32>
    %cst_21 = arith.constant 0.000000e+00 : f32
    %89 = vector.broadcast %cst_21 : f32 to vector<8x1xf32>
    %cst_22 = arith.constant dense<0x7F800000> : vector<8xf32>
    %90 = vector.multi_reduction <minimumf>, %87, %cst_22 [1] : vector<8x128xf32> to vector<8xf32>
    %91 = vector.shape_cast %90 : vector<8xf32> to vector<8x1xf32>
    %92 = vector.broadcast %91 : vector<8x1xf32> to vector<8x128xf32>
    %93 = arith.cmpf oeq, %87, %92 : vector<8x128xf32>
    %c128_i32 = arith.constant 128 : i32
    %94 = vector.broadcast %c128_i32 : i32 to vector<8x128xi32>
    %95 = arith.select %93, %88, %94 : vector<8x128xi1>, vector<8x128xi32>
    %cst_23 = arith.constant dense<2147483647> : vector<8xi32>
    %96 = vector.multi_reduction <minsi>, %95, %cst_23 [1] : vector<8x128xi32> to vector<8xi32>
    %97 = vector.shape_cast %96 : vector<8xi32> to vector<8x1xi32>
    %cst_24 = arith.constant 1.000000e+00 : f32
    %98 = vector.broadcast %cst_24 : f32 to vector<8x1xf32>
    %99 = arith.mulf %91, %98 : vector<8x1xf32>
    %100 = arith.addf %89, %99 : vector<8x1xf32>
    %101 = vector.broadcast %97 : vector<8x1xi32> to vector<8x128xi32>
    %102 = arith.cmpi eq, %88, %101 : vector<8x128xi32>
    %cst_25 = arith.constant 0x7F800000 : f32
    %103 = vector.broadcast %cst_25 : f32 to vector<8x128xf32>
    %104 = arith.select %102, %103, %87 : vector<8x128xi1>, vector<8x128xf32>
    %cst_26 = arith.constant dense<0x7F800000> : vector<8xf32>
    %105 = vector.multi_reduction <minimumf>, %104, %cst_26 [1] : vector<8x128xf32> to vector<8xf32>
    %106 = vector.shape_cast %105 : vector<8xf32> to vector<8x1xf32>
    %107 = vector.broadcast %106 : vector<8x1xf32> to vector<8x128xf32>
    %108 = arith.cmpf oeq, %104, %107 : vector<8x128xf32>
    %c128_i32_27 = arith.constant 128 : i32
    %109 = vector.broadcast %c128_i32_27 : i32 to vector<8x128xi32>
    %110 = arith.select %108, %88, %109 : vector<8x128xi1>, vector<8x128xi32>
    %cst_28 = arith.constant dense<2147483647> : vector<8xi32>
    %111 = vector.multi_reduction <minsi>, %110, %cst_28 [1] : vector<8x128xi32> to vector<8xi32>
    %112 = vector.shape_cast %111 : vector<8xi32> to vector<8x1xi32>
    %cst_29 = arith.constant 5.000000e-01 : f32
    %113 = vector.broadcast %cst_29 : f32 to vector<8x1xf32>
    %114 = arith.mulf %106, %113 : vector<8x1xf32>
    %115 = arith.addf %100, %114 : vector<8x1xf32>
    %116 = vector.broadcast %112 : vector<8x1xi32> to vector<8x128xi32>
    %117 = arith.cmpi eq, %88, %116 : vector<8x128xi32>
    %cst_30 = arith.constant 0x7F800000 : f32
    %118 = vector.broadcast %cst_30 : f32 to vector<8x128xf32>
    %119 = arith.select %117, %118, %104 : vector<8x128xi1>, vector<8x128xf32>
    %cst_31 = arith.constant dense<0x7F800000> : vector<8xf32>
    %120 = vector.multi_reduction <minimumf>, %119, %cst_31 [1] : vector<8x128xf32> to vector<8xf32>
    %121 = vector.shape_cast %120 : vector<8xf32> to vector<8x1xf32>
    %cst_32 = arith.constant 2.500000e-01 : f32
    %122 = vector.broadcast %cst_32 : f32 to vector<8x1xf32>
    %123 = arith.mulf %121, %122 : vector<8x1xf32>
    %124 = arith.addf %115, %123 : vector<8x1xf32>
    %cst_33 = arith.constant 0.571428597 : f32
    %125 = vector.broadcast %cst_33 : f32 to vector<8x1xf32>
    %126 = arith.mulf %124, %125 : vector<8x1xf32>
    %c0_34 = arith.constant 0 : index
    %c0_35 = arith.constant 0 : index
    %127 = vector.load %arg9[%c0_34, %c0_35] : memref<8x2xf32, #tpu.memory_space<vmem>>, vector<8x1xf32>
    tpu.vector_store %arg9[%c0_34, %c0_35], %29 {strides = array<i32>} : memref<8x2xf32, #tpu.memory_space<vmem>>, vector<8x1xf32>,
    %c0_36 = arith.constant 0 : index
    %c1 = arith.constant 1 : index
    %128 = vector.load %arg9[%c0_36, %c1] : memref<8x2xf32, #tpu.memory_space<vmem>>, vector<8x1xf32>
    tpu.vector_store %arg9[%c0_36, %c1], %126 {strides = array<i32>} : memref<8x2xf32, #tpu.memory_space<vmem>>, vector<8x1xf32>,
    return
  }
  func.func @transform_0(%arg0: i32) -> (i32, i32) {
    %c0_i32 = arith.constant 0 : i32
    %c0_i32_0 = arith.constant 0 : i32
    return %arg0, %c0_i32 : i32, i32
  }
  func.func @transform_1(%arg0: i32) -> (i32, i32) {
    %c0_i32 = arith.constant 0 : i32
    %c0_i32_0 = arith.constant 0 : i32
    %c0_i32_1 = arith.constant 0 : i32
    return %c0_i32, %c0_i32_0 : i32, i32
  }
  func.func @transform_2(%arg0: i32) -> (i32, i32) {
    %c0_i32 = arith.constant 0 : i32
    %c0_i32_0 = arith.constant 0 : i32
    %c0_i32_1 = arith.constant 0 : i32
    return %c0_i32, %c0_i32_0 : i32, i32
  }
  func.func @transform_3(%arg0: i32) -> (i32, i32) {
    %c0_i32 = arith.constant 0 : i32
    %c0_i32_0 = arith.constant 0 : i32
    %c0_i32_1 = arith.constant 0 : i32
    return %c0_i32, %c0_i32_0 : i32, i32
  }
  func.func @transform_4(%arg0: i32) -> (i32, i32) {
    %c0_i32 = arith.constant 0 : i32
    %c0_i32_0 = arith.constant 0 : i32
    %c0_i32_1 = arith.constant 0 : i32
    return %c0_i32, %c0_i32_0 : i32, i32
  }
  func.func @transform_5(%arg0: i32) -> (i32, i32) {
    %c0_i32 = arith.constant 0 : i32
    %c0_i32_0 = arith.constant 0 : i32
    %c0_i32_1 = arith.constant 0 : i32
    return %c0_i32, %c0_i32_0 : i32, i32
  }
  func.func @transform_6(%arg0: i32) -> (i32, i32) {
    %c0_i32 = arith.constant 0 : i32
    %c0_i32_0 = arith.constant 0 : i32
    %c0_i32_1 = arith.constant 0 : i32
    return %c0_i32, %c0_i32_0 : i32, i32
  }
  func.func @transform_7(%arg0: i32) -> (i32, i32) {
    %c0_i32 = arith.constant 0 : i32
    %c0_i32_0 = arith.constant 0 : i32
    %c0_i32_1 = arith.constant 0 : i32
    return %c0_i32, %c0_i32_0 : i32, i32
  }
  func.func @transform_8(%arg0: i32) -> (i32, i32) {
    %c0_i32 = arith.constant 0 : i32
    %c0_i32_0 = arith.constant 0 : i32
    return %arg0, %c0_i32 : i32, i32
  }
}

</mosaic_0001>

<bundles_post_ra>
// kernel: tpu_custom_call.1
= control target key start
LH: loop header
LB: loop body
LE: loop exit
PB: predicated region body
PF: predicated region fallthrough
CT: control target
= control target key end

     0   :  { %s840_s27 = smov 0   ;;  %s920_s0 = inlined_call_operand.vmem [shape: f32[32,40], index: 0, kind: input, shape index: {}]   ;;  %s921_s1 = inlined_call_operand.vmem [shape: f32[1,40], index: 1, kind: input, shape index: {}]   ;;  %s922_s2 = inlined_call_operand.vmem [shape: f32[1,40], index: 2, kind: input, shape index: {}]   ;;  %s923_s3 = inlined_call_operand.vmem [shape: f32[40,8], index: 3, kind: input, shape index: {}]   ;;  %s924_s4 = inlined_call_operand.vmem [shape: f32[1,8], index: 4, kind: input, shape index: {}]   ;;  %s925_s5 = inlined_call_operand.vmem [shape: f32[8,40], index: 5, kind: input, shape index: {}]   ;;  %s926_s6 = inlined_call_operand.vmem [shape: f32[1,40], index: 6, kind: input, shape index: {}]   ;;  %s927_s7 = inlined_call_operand.vmem [shape: f32[8,128], index: 7, kind: input, shape index: {}]   ;;  %s928_s8 = inlined_call_operand.vmem [shape: f32[32,2], index: 8, kind: output, shape index: {}]  }
   0x1 LB: > { %s698_s28 = sadd.s32 4294967295, %s782_s27   ;;  %p702_p0 = scmp.ge.s32.totalorder %s782_s27, 1  ;;  %s782_s27 = sphi %s840_s27, %s18_s27  }
   0x2   : > { %p261_p1 = scmp.lt.s32.totalorder %s782_s27, 5 }
   0x4   : > { %p262_p2 = pnand %p702_p0, %p261_p1 }
   0x5   : > { %v327_v0 = vld [vmem:[%s923_s3] sm:$0xff] (!%p262_p2)  ;;  %v328_v1 = vld [vmem:[%s923_s3 + $0x8] sm:$0xff] (!%p262_p2)  ;;  %v329_v2 = vld [vmem:[%s923_s3 + $0x10] sm:$0xff] (!%p262_p2)  ;;  %v313_v3 = vlaneseq (!%p262_p2)  ;;  %v784_v4 = vmov (!%p262_p2), 0.0|0.0   ;;  %vm785_vm0 = vmmov (!%p262_p2), 0   ;;  %v786_v7 = vmov (!%p262_p2), 0.0  }
   0x6   : > { %265 = sbr.rel (%p262_p2) target bundleno = 1435 (0x59b), region = 52  ;;  %738 = vmatprep.subr.bf16.mxu0 (!%p262_p2), %v784_v4  ;;  %v739_v5 = vpack.c.bf16 (!%p262_p2), %v328_v1, %v327_v0  ;;  %v330_v6 = vld [vmem:[%s923_s3 + $0x18] sm:$0xff] (!%p262_p2)  ;;  %730 = vmatprep.mubr.msk.f32.mxu0 (!%p262_p2), %vm785_vm0, %v786_v7  ;;  %p293_p3 = scmp.lt.s32.totalorder (!%p262_p2), %s698_s28, 3  ;;  %v303_v10 = vld [vmem:[%s922_s2] sm:$0x1] (!%p262_p2)  ;;  %v787_v11 = vmov (!%p262_p2), 0  }
   0x7   : > { %v861_v8 = vshrl.u32 (!%p262_p2), %v313_v3, 7  ;;  %733 = vmatprep.subr.mxu1 (!%p262_p2), %v786_v7  ;;  %735 = vmatprep.mubr.msk.f32.mxu1 (!%p262_p2), %vm785_vm0, %v786_v7  ;;  %v742_v9 = vpack.c.bf16 (!%p262_p2), %v330_v6, %v329_v2  ;;  %v331_v14 = vld [vmem:[%s923_s3 + $0x20] sm:$0xff] (!%p262_p2)  ;;  %vm304_vm1 = vcmp.eq.f32.partialorder (!%p262_p2), %v303_v10, 0.0  ;;  %vm339_vm3 = vcmask (!%p262_p2), 326656  }
   0x8   : > { %740 = vmatpush3.bf16.msra.mxu0 (!%p262_p2), %v739_v5  ;;  %763 = vset.pattern.permute.xlu0 (!%p262_p2), %v787_v11  ;;  %v320_v15 = vsel (!%p262_p2), %vm304_vm1, 1, %v787_v11  ;;  %v705_v17 = vld [vmem:[%s921_s1] ss:$0 sm:$0xff] (!%p262_p2)  ;;  %v788_v24 = vmov (!%p262_p2), 2   ;;  %vm422_vm4 = vcmask (!%p262_p2), 64512   ;;  %v789_v30 = vmov (!%p262_p2), 3  }
   0x9   : > { %741 = vmatprep.subr.bf16.mxu0 (!%p262_p2), %v784_v4  ;;  %v869_v12 = vsub.s32 (!%p262_p2), 0, %v861_v8  ;;  %v414_v23 = vld [vmem:[%s925_s5] sm:$0xff] (!%p262_p2)  ;;  %765 = vset.pattern.permute.xlu1 (!%p262_p2), %v788_v24  ;;  %v790_v31 = vmov (!%p262_p2), 1   ;;  %v791_v32 = vmov (!%p262_p2), 4   ;;  %v792_v33 = vmov (!%p262_p2), 5  }
   0xa   : > { %734 = vmatpush3.msra.mxu1 (!%p262_p2), %v414_v23  ;;  %v706_v25 = vld [vmem:[%s924_s4] ss:$0 sm:$0xff] (!%p262_p2)  ;;  %v793_v34 = vmov (!%p262_p2), 6   ;;  %v794_v35 = vmov (!%p262_p2), 7   ;;  %v527_v37 = vsub.s32 (!%p262_p2), 2, %v861_v8  ;;  %v516_v38 = vsub.s32 (!%p262_p2), 1, %v861_v8 }
   0xb   : > { %v316_v13 = vrot.slane (!%p262_p2), %v303_v10, %v869_v12  ;;  %v324_v18 = vrot.slane (!%p262_p2), %v320_v15, %v869_v12  ;;  %v502_v36 = vld [vmem:[%s927_s7] sm:$0xff] (!%p262_p2)  ;;  %v538_v42 = vsub.s32 (!%p262_p2), 3, %v861_v8  ;;  %v549_v45 = vsub.s32 (!%p262_p2), 4, %v861_v8 }
   0xc   : > { %743 = vmatpush3.bf16.msra.mxu0 (!%p262_p2), %v742_v9  ;;  %v506_v40 = vrot.slane (!%p262_p2), %v502_v36, %v869_v12  ;;  %v528_v43 = vrot.slane (!%p262_p2), %v502_v36, %v527_v37  ;;  %v517_v44 = vrot.slane (!%p262_p2), %v502_v36, %v516_v38  ;;  %v560_v50 = vsub.s32 (!%p262_p2), 5, %v861_v8 }
   0xd   : > { %s930_s28 = smov (!%p293_p3, %s698_s28), 3  ;;  %728 = vmatprep.subr.mxu0 %v786_v7  ;;  %772 = vrcp.f32 %v316_v13  ;;  %vm325_vm2 = vcmp.eq.s32.totalorder %v324_v18, 1  ;;  %v539_v47 = vrot.slane %v502_v36, %v538_v42  ;;  %v550_v53 = vrot.slane %v502_v36, %v549_v45 }
   0xe   : > { %s703_s17 = sshll.u32 %s930_s28, 3  ;;  %v571_v57 = vsub.s32 6, %v861_v8  ;;  %v561_v58 = vrot.slane %v502_v36, %v560_v50  ;;  %v582_v6 = vsub.s32 7, %v861_v8  ;;  %v592_v24 = vand.u32 127, %v313_v3 }
   0xf   : > { %s296_s22 = scalar_lea.vmem %s920_s0, %s703_s17  ;;  %s300_s15 = scalar_lea.vmem %s928_s8, %s703_s17  ;;  %vm641_vm10 = vcmask 7168   ;;  %vm643_vm12 = vcmask 15368  }
  0x10   : > { %729 = vmatpush3.msra.mxu0 %v331_v14  ;;  %v301_v16 = vld [vmem:[%s296_s22] sm:$0xff]  ;;  %v572_v2 = vrot.slane %v502_v36, %v571_v57  ;;  %v583_v13 = vrot.slane %v502_v36, %v582_v6 }
  0x11   : > { %v311_v19 = vsub.f32 %v301_v16, %v705_v17 }
  0x17   : > { %v773_v20 = vpop.eup %772 }
  0x18   : > { %v319_v21 = vmul.f32 %v773_v20, %v311_v19 }
  0x1a   : > { %v885_v22 = vsel %vm325_vm2, 0.0, %v319_v21 }
  0x1b   : > { %731 = vmatmul.mubr.msk.f32.vlgmr.msra.gmra.mrb[0].mxu0 %vm339_vm3, %v885_v22 }
  0xee   : > { %v409_v26 = vpop.f32.mrb[0].mxu0 }
  0xef   : > { %v410_v27 = vadd.f32 %v706_v25, %v409_v26  ;;  %v732_v28 = vpop.f32.mrb[1].mxu0 }
  0xf1   : > { %774 = vtanh.f32 %v410_v27 }
  0xfb   : > { %v775_v29 = vpop.eup %774 }
  0xfc   : > { %530 = vperm.xlu1 %765, %v775_v29   ;;  %508 = vperm.xlu0 %763, %v775_v29  }
  0xfd   : > { %736 = vmatmul.mubr.msk.f32.vlgmr.msra.gmra.mrb[0].mxu1 %vm422_vm4, %v775_v29 }
 0x100   : > { %766 = vset.pattern.permute.xlu1 %v789_v30  ;;  %764 = vset.pattern.permute.xlu0 %v790_v31 }
 0x101   : > { %541 = vperm.xlu1 %766, %v775_v29   ;;  %519 = vperm.xlu0 %764, %v775_v29  }
 0x105   : > { %767 = vset.pattern.permute.xlu1 %v791_v32  ;;  %768 = vset.pattern.permute.xlu0 %v792_v33 }
 0x106   : > { %552 = vperm.xlu1 %767, %v775_v29   ;;  %563 = vperm.xlu0 %768, %v775_v29  }
 0x10a   : > { %769 = vset.pattern.permute.xlu1 %v793_v34  ;;  %771 = vset.pattern.permute.xlu0 %v794_v35 }
 0x10b   : > { %574 = vperm.xlu1 %769, %v775_v29  }
 0x10f   : > { %770 = vset.pattern.permute.xlu1 %v794_v35 }
 0x110   : > { %585 = vperm.xlu1 %770, %v775_v29  }
 0x17b   : > { %v531_v39 = vpop.permute.xlu1 %530  ;;  %v509_v41 = vpop.permute.xlu0 %508 }
 0x17c   : > { %v511_v46 = vsub.f32 %v506_v40, %v509_v41  ;;  %v533_v51 = vsub.f32 %v528_v43, %v531_v39  ;;  %v708_v41 = vld [vmem:[%s926_s6] ss:$0 sm:$0xff] }
 0x17e   : > { %v512_v54 = vand.u32 2147483647, %v511_v46  ;;  %v534_v59 = vand.u32 2147483647, %v533_v51 }
 0x180   : > { %v542_v48 = vpop.permute.xlu1 %541  ;;  %v520_v49 = vpop.permute.xlu0 %519 }
 0x181   : > { %v522_v52 = vsub.f32 %v517_v44, %v520_v49  ;;  %v544_v55 = vsub.f32 %v539_v47, %v542_v48 }
 0x183   : > { %v523_v56 = vand.u32 2147483647, %v522_v52  ;;  %v545_v0 = vand.u32 2147483647, %v544_v55 }
 0x185   : > { %v524_v60 = vadd.f32 %v523_v56, %v512_v54  ;;  %v553_v61 = vpop.permute.xlu1 %552  ;;  %v564_v62 = vpop.permute.xlu0 %563 }
 0x186   : > { %v555_v63 = vsub.f32 %v550_v53, %v553_v61  ;;  %v566_v5 = vsub.f32 %v561_v58, %v564_v62 }
 0x187   : > { %v535_v1 = vadd.f32 %v534_v59, %v524_v60 }
 0x188   : > { %v556_v4 = vand.u32 2147483647, %v555_v63  ;;  %v567_v12 = vand.u32 2147483647, %v566_v5 }
 0x189   : > { %v546_v7 = vadd.f32 %v545_v0, %v535_v1 }
 0x18a   : > { %v575_v9 = vpop.permute.xlu1 %574 }
 0x18b   : > { %v557_v10 = vadd.f32 %v556_v4, %v546_v7  ;;  %v577_v11 = vsub.f32 %v572_v2, %v575_v9 }
 0x18d   : > { %v568_v14 = vadd.f32 %v567_v12, %v557_v10  ;;  %v578_v15 = vand.u32 2147483647, %v577_v11 }
 0x18f   : > { %v586_v16 = vpop.permute.xlu1 %585  ;;  %v579_v18 = vadd.f32 %v578_v15, %v568_v14 }
 0x190   : > { %v588_v17 = vsub.f32 %v583_v13, %v586_v16 }
 0x192   : > { %v589_v19 = vand.u32 2147483647, %v588_v17 }
 0x194   : > { %v590_v20 = vadd.f32 %v589_v19, %v579_v18 }
 0x196   : > { %593 = vmin.xlane.f32.xlu0 %v590_v20 }
 0x1d0   : > { %v492_v21 = vpop.f32.mrb[0].mxu1 }
 0x1d1   : > { %v737_v23 = vpop.f32.mrb[1].mxu1  ;;  %v493_v42 = vadd.f32 %v708_v41, %v492_v21 }
 0x1d3   : > { %v496_v44 = vsub.f32 %v493_v42, %v885_v22 }
 0x1d5   : > { %v497_v48 = vmul.f32 %v496_v44, %v496_v44 }
 0x1d7   : > { %v498_v49 = vsel %vm339_vm3, %v497_v48, 0.0 }
 0x223   : > { %v594_v25 = vpop.xlane.xlu0 %593 }
 0x224   : > { %vm595_vm5 = vcmp.eq.f32.partialorder %v590_v20, %v594_v25 }
 0x225   : > { %v596_v8 = vsel %vm595_vm5, %v592_v24, 128 }
 0x226   : > { %v598_v26 = vshra.s32 %v596_v8, 16  ;;  %v597_v28 = vand.u32 65535, %v596_v8 }
 0x228   : > { %v600_v27 = vcvt.s32.f32 %v598_v26  ;;  %v599_v30 = vcvt.s32.f32 %v597_v28 }
 0x22a   : > { %601 = vmin.xlane.f32.xlu1 %v600_v27 }
 0x2b7   : > { %v602_v29 = vpop.xlane.xlu1 %601 }
 0x2b8   : > { %vm603_vm6 = vcmp.eq.f32.partialorder %v600_v27, %v602_v29  ;;  %v608_v32 = vcvt.f32.s32 %v602_v29 }
 0x2b9   : > { %v604_v31 = vsel %vm603_vm6, %v599_v30, inf }
 0x2ba   : > { %605 = vmin.xlane.f32.xlu0 %v604_v31  ;;  %v609_v34 = vshll.u32 %v608_v32, 16 }
 0x347   : > { %v606_v33 = vpop.xlane.xlu0 %605 }
 0x348   : > { %v607_v35 = vcvt.f32.s32 %v606_v33 }
 0x34a   : > { %v610_v36 = vadd.s32 %v609_v34, %v607_v35 }
 0x34c   : > { %vm612_vm7 = vcmp.eq.s32.totalorder %v592_v24, %v610_v36 }
 0x34d   : > { %v613_v37 = vsel %vm612_vm7, inf, %v590_v20 }
 0x34e   : > { %614 = vmin.xlane.f32.xlu0 %v613_v37 }
 0x3db   : > { %v615_v3 = vpop.xlane.xlu0 %614 }
 0x3dc   : > { %vm616_vm8 = vcmp.eq.f32.partialorder %v613_v37, %v615_v3  ;;  %v632_v57 = vmul.f32 0.5, %v615_v3 }
 0x3dd   : > { %v617_v38 = vsel %vm616_vm8, %v592_v24, 128 }
 0x3de   : > { %v619_v39 = vshra.s32 %v617_v38, 16  ;;  %v618_v43 = vand.u32 65535, %v617_v38  ;;  %v633_v59 = vadd.f32 %v632_v57, %v594_v25 }
 0x3e0   : > { %v621_v40 = vcvt.s32.f32 %v619_v39  ;;  %v620_v46 = vcvt.s32.f32 %v618_v43 }
 0x3e2   : > { %622 = vmin.xlane.f32.xlu1 %v621_v40 }
 0x46f   : > { %v623_v45 = vpop.xlane.xlu1 %622 }
 0x470   : > { %vm624_vm9 = vcmp.eq.f32.partialorder %v621_v40, %v623_v45  ;;  %v629_v50 = vcvt.f32.s32 %v623_v45 }
 0x471   : > { %v625_v47 = vsel %vm624_vm9, %v620_v46, inf }
 0x472   : > { %626 = vmin.xlane.f32.xlu0 %v625_v47  ;;  %v630_v52 = vshll.u32 %v629_v50, 16 }
 0x476   : > { %499 = vadd.xlane.f32.xlu0 %v498_v49 }
 0x4ff   : > { %v627_v51 = vpop.xlane.xlu0 %626 }
 0x500   : > { %v628_v53 = vcvt.f32.s32 %v627_v51 }
 0x502   : > { %v631_v54 = vadd.s32 %v630_v52, %v628_v53 }
 0x503   : > { %v500_v22 = vpop.xlane.xlu0 %499 }
 0x504   : > { %v501_v55 = vmul.f32 0.025, %v500_v22  ;;  %vm634_vm11 = vcmp.eq.s32.totalorder %v592_v24, %v631_v54 }
 0x505   : > { %v635_v56 = vsel %vm634_vm11, inf, %v613_v37 }
 0x506   : > { %642 = vst.msk [vmem:[%s300_s15] sm:$0xff] %vm641_vm10, %v501_v55  ;;  %636 = vmin.xlane.f32.xlu1 %v635_v56 }
 0x593   : > { %v637_v58 = vpop.xlane.xlu1 %636 }
 0x594   : > { %v638_v60 = vmul.f32 0.25, %v637_v58 }
 0x596   : > { %v639_v61 = vadd.f32 %v638_v60, %v633_v59 }
 0x598   : > { %v640_v62 = vmul.f32 0.5714286, %v639_v61 }
 0x59a   : > { %644 = vst.msk [vmem:[%s300_s15] sm:$0xff] %vm643_vm12, %v640_v62 }
 0x59b PF: > { %s18_s27 = sadd.s32 1, %s782_s27  }
 0x59c   : > { %p15_p4 = scmp.ge.s32.totalorder %s18_s27, 6  }
 0x59e   :  { %17 = sbr.rel (!%p15_p4) target bundleno = 1 (0x1), region = 82 }

</bundles_post_ra>
